<compile_context>
chip_gen: v6e
topology: v6e:2x2x1
jax: 0.10.0
libtpu: 0.0.40
codegen_flags: <defaults>
</compile_context>

<pallas_src>
import math
import jax
import jax.numpy as jnp
from jax.experimental import pallas as pl
from jax.experimental.pallas import tpu as pltpu


def _temporal_attn_kernel(q_ref, src_ref, wq_ref, wk_ref, wv_ref, out_ref):
    """One grid step = one batch element b; P and N are collapsed into the block."""
    _, P, N, S, D = src_ref.shape

    # Query projection (shared across all P trends: PyTorch repeat(1, nre, 1)),
    # computed once per batch; fold the 1/sqrt(d) scale here (d = nhid*4 = D).
    q = q_ref[0]                                              # (N*S, D)
    scale = 1.0 / math.sqrt(D)
    qp = jnp.dot(q, wq_ref[...], preferred_element_type=jnp.float32) * scale

    # Batched K / V projections: one (P*N*S, D) @ (D, D) matmul each.
    src = src_ref[0].reshape(P * N * S, D)                    # (P*N*S, D)
    kp = jnp.dot(src, wk_ref[...], preferred_element_type=jnp.float32)
    vp = jnp.dot(src, wv_ref[...], preferred_element_type=jnp.float32)

    kp = kp.reshape(P * N, S, D)
    vp = vp.reshape(P * N, S, D)
    # Identical queries for every p (repeat over the trend axis).
    qb = jnp.broadcast_to(qp.reshape(1, N, S, D), (P, N, S, D)).reshape(P * N, S, D)

    # Scores: contract last dims directly -> no transposed copy of kp.
    scores = jnp.einsum("bsd,btd->bst", qb, kp,
                        preferred_element_type=jnp.float32)   # (P*N, S, S)

    # Row-wise softmax; denominator via EUP approximate reciprocal.
    m = jnp.max(scores, axis=-1, keepdims=True)
    e = jnp.exp(scores - m)
    attn = e * pl.reciprocal(jnp.sum(e, axis=-1, keepdims=True), approx=True)
    # TODO(synk): F.dropout on attention / output is a no-op in eval mode (training=False).

    feat = jnp.einsum("bst,btd->bsd", attn, vp,
                      preferred_element_type=jnp.float32)     # (P*N, S, D)

    # Sum over the P trends (nre != 7 -> feat.sum(1, keepdim=True)).
    out = feat.reshape(P, N, S, D).sum(axis=0)                # (N, S, D)
    out_ref[0, 0] = out.astype(out_ref.dtype)


def temporal_attention_forward(combine_list, gt_embed, Wq, Wk, Wv):
    B, P, N, S, D = combine_list.shape
    assert gt_embed.shape == (B, N * S, D)

    return pl.pallas_call(
        _temporal_attn_kernel,
        out_shape=jax.ShapeDtypeStruct((B, 1, N, S, D), combine_list.dtype),
        grid_spec=pltpu.PrefetchScalarGridSpec(
            num_scalar_prefetch=0,
            grid=(B,),  # keep B parallel so v7x's two TensorCores each take a batch
            in_specs=[
                pl.BlockSpec((1, N * S, D), lambda b: (b, 0, 0)),
                pl.BlockSpec((1, P, N, S, D), lambda b: (b, 0, 0, 0, 0)),
                pl.BlockSpec((D, D), lambda b: (0, 0)),
                pl.BlockSpec((D, D), lambda b: (0, 0)),
                pl.BlockSpec((D, D), lambda b: (0, 0)),
            ],
            out_specs=pl.BlockSpec((1, 1, N, S, D), lambda b: (b, 0, 0, 0, 0)),
        ),
        compiler_params=pltpu.CompilerParams(
            dimension_semantics=("parallel",)),
    )(gt_embed, combine_list, Wq, Wk, Wv)


def reference(combine_list, gt_embed, Wq, Wk, Wv, nre):
    """Pure-JAX transcription of DotProductAttentionLayer.forward (eval mode)."""
    B, P, N, S, D = combine_list.shape
    d = gt_embed.shape[-1]
    target = jnp.matmul(gt_embed, Wq)
    target = jnp.tile(target, (1, nre, 1)).reshape(B, P, N, S, D)
    attention = jnp.matmul(target, jnp.swapaxes(jnp.matmul(combine_list, Wk), -2, -1))
    attention = attention / math.sqrt(d)
    attention = jax.nn.softmax(attention, axis=-1)
    feat = jnp.matmul(attention, jnp.matmul(combine_list, Wv))
    if nre == 7:
        feat = feat.sum(2, keepdims=True)
    else:
        feat = feat.sum(1, keepdims=True)
    return feat


if __name__ == "__main__":
    nhid = 8
    D = nhid * 4           # 32
    p_nre = 4              # TemporalAttentionLayer's `p` -> DotProductAttentionLayer's nre
    B, N, S = 2, 2, 8

    key = jax.random.PRNGKey(0)
    k1, k2, k3, k4, k5 = jax.random.split(key, 5)
    # xavier_uniform_(gain=1.414) on a (D, D) matrix
    bound = 1.414 * math.sqrt(6.0 / (D + D))
    Wq = jax.random.uniform(k1, (D, D), jnp.float32, -bound, bound)
    Wk = jax.random.uniform(k2, (D, D), jnp.float32, -bound, bound)
    Wv = jax.random.uniform(k3, (D, D), jnp.float32, -bound, bound)

    combine_list = jax.random.normal(k4, (B, p_nre, N, S, D), jnp.float32)
    gt_embed = jax.random.normal(k5, (B, N * S, D), jnp.float32)

    out = temporal_attention_forward(combine_list, gt_embed, Wq, Wk, Wv)
    out = jax.block_until_ready(out)

    ref = reference(combine_list, gt_embed, Wq, Wk, Wv, p_nre)
    assert out.shape == (B, 1, N, S, D)
    # Tolerance relaxed slightly vs exact division: the softmax denominator uses the
    # EUP approximate reciprocal (~1e-3-level error); real bugs would show O(1) diffs.
    assert jnp.allclose(out, ref, atol=1e-2, rtol=1e-2), "mismatch vs pure-JAX reference"
    print("KERNEL_OK")
</pallas_src>

<mosaic_0001>
module attributes {stable_mosaic.version = 11 : i64} {
  func.func @_temporal_attn_kernel(%arg0: i32, %arg1: memref<1x16x32xf32, #tpu.memory_space<vmem>>, %arg2: memref<1x4x2x8x32xf32, #tpu.memory_space<vmem>>, %arg3: memref<32x32xf32, #tpu.memory_space<vmem>>, %arg4: memref<32x32xf32, #tpu.memory_space<vmem>>, %arg5: memref<32x32xf32, #tpu.memory_space<vmem>>, %arg6: memref<1x1x2x8x32xf32, #tpu.memory_space<vmem>>) attributes {dimension_semantics = [#tpu.dimension_semantics<parallel>], iteration_bounds = array<i64: 2>, scalar_prefetch = 0 : i64, scratch_operands = 0 : i64, tpu.core_type = #tpu.core_type<tc>, window_params = [{transform_indices = @transform_0, window_bounds = array<i64: 1, 16, 32>}, {transform_indices = @transform_1, window_bounds = array<i64: 1, 4, 2, 8, 32>}, {pipeline_mode = #tpu.pipeline_mode<synchronous>, transform_indices = @transform_2, window_bounds = array<i64: 32, 32>}, {pipeline_mode = #tpu.pipeline_mode<synchronous>, transform_indices = @transform_3, window_bounds = array<i64: 32, 32>}, {pipeline_mode = #tpu.pipeline_mode<synchronous>, transform_indices = @transform_4, window_bounds = array<i64: 32, 32>}, {transform_indices = @transform_5, window_bounds = array<i64: 1, 1, 2, 8, 32>}]} {
    %c0 = arith.constant 0 : index
    %c0_0 = arith.constant 0 : index
    %c0_1 = arith.constant 0 : index
    %0 = vector.load %arg1[%c0, %c0_0, %c0_1] : memref<1x16x32xf32, #tpu.memory_space<vmem>>, vector<1x16x32xf32>
    %1 = vector.shape_cast %0 : vector<1x16x32xf32> to vector<16x32xf32>
    %c0_2 = arith.constant 0 : index
    %c0_3 = arith.constant 0 : index
    %2 = vector.load %arg3[%c0_2, %c0_3] : memref<32x32xf32, #tpu.memory_space<vmem>>, vector<32x32xf32>
    %cst = arith.constant dense<0.000000e+00> : vector<16x32xf32>
    %3 = tpu.matmul %1, %2, %cst {dimension_numbers = #tpu.dot_dimension_numbers<[1], [0], [0], [1], [0, 0, 1, 1], [], []>} : vector<16x32xf32>, vector<32x32xf32>, vector<16x32xf32> -> vector<16x32xf32>
    %cst_4 = arith.constant 0.176776692 : f32
    %4 = vector.broadcast %cst_4 : f32 to vector<16x32xf32>
    %5 = arith.mulf %3, %4 : vector<16x32xf32>
    %c0_5 = arith.constant 0 : index
    %c0_6 = arith.constant 0 : index
    %c0_7 = arith.constant 0 : index
    %c0_8 = arith.constant 0 : index
    %c0_9 = arith.constant 0 : index
    %6 = vector.load %arg2[%c0_5, %c0_6, %c0_7, %c0_8, %c0_9] : memref<1x4x2x8x32xf32, #tpu.memory_space<vmem>>, vector<1x4x2x8x32xf32>
    %7 = vector.shape_cast %6 : vector<1x4x2x8x32xf32> to vector<4x2x8x32xf32>
    %8 = vector.shape_cast %7 : vector<4x2x8x32xf32> to vector<64x32xf32>
    %c0_10 = arith.constant 0 : index
    %c0_11 = arith.constant 0 : index
    %9 = vector.load %arg4[%c0_10, %c0_11] : memref<32x32xf32, #tpu.memory_space<vmem>>, vector<32x32xf32>
    %cst_12 = arith.constant dense<0.000000e+00> : vector<64x32xf32>
    %10 = tpu.matmul %8, %9, %cst_12 {dimension_numbers = #tpu.dot_dimension_numbers<[1], [0], [0], [1], [0, 0, 1, 1], [], []>} : vector<64x32xf32>, vector<32x32xf32>, vector<64x32xf32> -> vector<64x32xf32>
    %c0_13 = arith.constant 0 : index
    %c0_14 = arith.constant 0 : index
    %11 = vector.load %arg5[%c0_13, %c0_14] : memref<32x32xf32, #tpu.memory_space<vmem>>, vector<32x32xf32>
    %cst_15 = arith.constant dense<0.000000e+00> : vector<64x32xf32>
    %12 = tpu.matmul %8, %11, %cst_15 {dimension_numbers = #tpu.dot_dimension_numbers<[1], [0], [0], [1], [0, 0, 1, 1], [], []>} : vector<64x32xf32>, vector<32x32xf32>, vector<64x32xf32> -> vector<64x32xf32>
    %13 = vector.shape_cast %10 : vector<64x32xf32> to vector<8x8x32xf32>
    %14 = vector.shape_cast %12 : vector<64x32xf32> to vector<8x8x32xf32>
    %15 = vector.shape_cast %5 : vector<16x32xf32> to vector<1x2x8x32xf32>
    %16 = vector.shape_cast %15 : vector<1x2x8x32xf32> to vector<1x2x8x32xf32>
    %17 = vector.broadcast %16 : vector<1x2x8x32xf32> to vector<4x2x8x32xf32>
    %18 = vector.shape_cast %17 : vector<4x2x8x32xf32> to vector<8x8x32xf32>
    "tpu.trace_start"() <{level = 10 : i32, message = "bsd,btd->bst"}> : () -> ()
    %cst_16 = arith.constant dense<0.000000e+00> : vector<8x8x8xf32>
    %19 = tpu.matmul %18, %13, %cst_16 {dimension_numbers = #tpu.dot_dimension_numbers<[2], [2], [1], [1], [0, 0, 0, 1, 1, 1], [0], [0]>} : vector<8x8x32xf32>, vector<8x8x32xf32>, vector<8x8x8xf32> -> vector<8x8x8xf32>
    "tpu.trace_stop"() : () -> ()
    %cst_17 = arith.constant dense<0xFF800000> : vector<8x8xf32>
    %20 = vector.multi_reduction <maximumf>, %19, %cst_17 [2] : vector<8x8x8xf32> to vector<8x8xf32>
    %21 = vector.shape_cast %20 : vector<8x8xf32> to vector<8x8x1xf32>
    %22 = vector.broadcast %21 : vector<8x8x1xf32> to vector<8x8x8xf32>
    %23 = arith.subf %19, %22 : vector<8x8x8xf32>
    %24 = math.exp %23 : vector<8x8x8xf32>
    %cst_18 = arith.constant dense<0.000000e+00> : vector<8x8xf32>
    %25 = vector.multi_reduction <add>, %24, %cst_18 [2] : vector<8x8x8xf32> to vector<8x8xf32>
    %26 = vector.shape_cast %25 : vector<8x8xf32> to vector<8x8x1xf32>
    %27 = tpu.reciprocal %26 {approx = true} : vector<8x8x1xf32> -> vector<8x8x1xf32>
    %28 = vector.broadcast %27 : vector<8x8x1xf32> to vector<8x8x8xf32>
    %29 = arith.mulf %24, %28 : vector<8x8x8xf32>
    "tpu.trace_start"() <{level = 10 : i32, message = "bst,btd->bsd"}> : () -> ()
    %cst_19 = arith.constant dense<0.000000e+00> : vector<8x8x32xf32>
    %30 = tpu.matmul %29, %14, %cst_19 {dimension_numbers = #tpu.dot_dimension_numbers<[2], [1], [1], [2], [0, 0, 0, 1, 1, 2], [0], [0]>} : vector<8x8x8xf32>, vector<8x8x32xf32>, vector<8x8x32xf32> -> vector<8x8x32xf32>
    "tpu.trace_stop"() : () -> ()
    %31 = vector.shape_cast %30 : vector<8x8x32xf32> to vector<4x2x8x32xf32>
    %cst_20 = arith.constant dense<0.000000e+00> : vector<2x8x32xf32>
    %32 = vector.multi_reduction <add>, %31, %cst_20 [0] : vector<4x2x8x32xf32> to vector<2x8x32xf32>
    %c0_21 = arith.constant 0 : index
    %c0_22 = arith.constant 0 : index
    %c0_23 = arith.constant 0 : index
    %c0_24 = arith.constant 0 : index
    %c0_25 = arith.constant 0 : index
    %33 = vector.load %arg6[%c0_21, %c0_22, %c0_23, %c0_24, %c0_25] : memref<1x1x2x8x32xf32, #tpu.memory_space<vmem>>, vector<1x1x2x8x32xf32>
    %34 = vector.shape_cast %33 : vector<1x1x2x8x32xf32> to vector<2x8x32xf32>
    %35 = vector.shape_cast %32 : vector<2x8x32xf32> to vector<1x1x2x8x32xf32>
    tpu.vector_store %arg6[%c0_21, %c0_22, %c0_23, %c0_24, %c0_25], %35 {strides = array<i32>} : memref<1x1x2x8x32xf32, #tpu.memory_space<vmem>>, vector<1x1x2x8x32xf32>,
    return
  }
  func.func @transform_0(%arg0: i32) -> (i32, i32, i32) {
    %c0_i32 = arith.constant 0 : i32
    %c0_i32_0 = arith.constant 0 : i32
    %c0_i32_1 = arith.constant 0 : i32
    return %arg0, %c0_i32, %c0_i32_0 : i32, i32, i32
  }
  func.func @transform_1(%arg0: i32) -> (i32, i32, i32, i32, i32) {
    %c0_i32 = arith.constant 0 : i32
    %c0_i32_0 = arith.constant 0 : i32
    %c0_i32_1 = arith.constant 0 : i32
    %c0_i32_2 = arith.constant 0 : i32
    %c0_i32_3 = arith.constant 0 : i32
    return %arg0, %c0_i32, %c0_i32_0, %c0_i32_1, %c0_i32_2 : i32, i32, i32, i32, i32
  }
  func.func @transform_2(%arg0: i32) -> (i32, i32) {
    %c0_i32 = arith.constant 0 : i32
    %c0_i32_0 = arith.constant 0 : i32
    %c0_i32_1 = arith.constant 0 : i32
    return %c0_i32, %c0_i32_0 : i32, i32
  }
  func.func @transform_3(%arg0: i32) -> (i32, i32) {
    %c0_i32 = arith.constant 0 : i32
    %c0_i32_0 = arith.constant 0 : i32
    %c0_i32_1 = arith.constant 0 : i32
    return %c0_i32, %c0_i32_0 : i32, i32
  }
  func.func @transform_4(%arg0: i32) -> (i32, i32) {
    %c0_i32 = arith.constant 0 : i32
    %c0_i32_0 = arith.constant 0 : i32
    %c0_i32_1 = arith.constant 0 : i32
    return %c0_i32, %c0_i32_0 : i32, i32
  }
  func.func @transform_5(%arg0: i32) -> (i32, i32, i32, i32, i32) {
    %c0_i32 = arith.constant 0 : i32
    %c0_i32_0 = arith.constant 0 : i32
    %c0_i32_1 = arith.constant 0 : i32
    %c0_i32_2 = arith.constant 0 : i32
    %c0_i32_3 = arith.constant 0 : i32
    return %arg0, %c0_i32, %c0_i32_0, %c0_i32_1, %c0_i32_2 : i32, i32, i32, i32, i32
  }
}

</mosaic_0001>

<bundles_post_ra>
// kernel: tpu_custom_call.1
= control target key start
LH: loop header
LB: loop body
LE: loop exit
PB: predicated region body
PF: predicated region fallthrough
CT: control target
= control target key end

     0   :  { %s3135_s0 = inlined_call_operand.hbm [shape: f32[2,16,32], index: 0, kind: input, shape index: {}]   ;;  %s3136_s1 = inlined_call_operand.hbm [shape: f32[2,4,2,8,32], index: 1, kind: input, shape index: {}]   ;;  %s3137_s2 = inlined_call_operand.hbm [shape: f32[32,32], index: 2, kind: input, shape index: {}]   ;;  %s3138_s3 = inlined_call_operand.hbm [shape: f32[32,32], index: 3, kind: input, shape index: {}]   ;;  %s3139_s4 = inlined_call_operand.hbm [shape: f32[32,32], index: 4, kind: input, shape index: {}]   ;;  %s3140_s5 = inlined_call_operand.hbm [shape: f32[2,1,2,8,32], index: 5, kind: output, shape index: {}]  }
   0x1   :  { %3144 = sst [smem:[#allocation17_spill]] %s3135_s0 }
   0x2   :  { %3145 = sst [smem:[#allocation18_spill]] %s3137_s2 }
   0x3   :  { %3146 = sst [smem:[#allocation19_spill]] %s3138_s3 }
   0x4   :  { %10 = vsyncpa [#allocation3], 0 }
   0x5   :  { %12 = vsyncpa [#allocation3 + $0x1], 0 }
   0x6   :  { %13 = vsyncpa [#allocation6], 0 }
   0x7   :  { %15 = vsyncpa [#allocation6 + $0x1], 0 }
   0x8   :  { %16 = vsyncpa [#allocation9], 0 }
   0x9   :  { %17 = vsyncpa [#allocation4], 0 }
   0xa   :  { %19 = vsyncpa [#allocation4 + $0x1], 0  ;;  %s2719_s18 = smov 0   ;;  %s2721_s19 = smov 0  }
   0xb   :  { %s2723_s20 = smov 0   ;;  %s2725_s21 = smov 0  }
   0xc LB: > { %s2740_s22 = sadd.s32 4294967295, %s2675_s21   ;;  %s2083_s23 = sadd.s32 4294967294, %s2675_s21   ;;  %s2675_s21 = sphi %s2725_s21, %s3169_s21   ;;  %s2671_s20 = sphi %s2723_s20, %s3168_s20   ;;  %s2667_s19 = sphi %s2721_s19, %s3167_s19   ;;  %s2663_s18 = sphi %s2719_s18, %s3166_s18  }
   0xd   : > { %p45_p0 = scmp.ne.s32.totalorder %s2667_s19, %s2663_s18  ;;  %p3141_p1 = scmp.eq.s32.totalorder %s2740_s22, 0 }
   0xe   : > { %p158_p2 = scmp.eq.s32.totalorder %s2740_s22, 1  ;;  %p164_p3 = scmp.eq.s32.totalorder %s2083_s23, 1 }
   0xf   : > { %p2749_p4 = por %p3141_p1, %p45_p0  ;;  %p2084_p5 = scmp.ge.s32.totalorder %s2675_s21, 1 }
  0x10   : > { %p2754_p6 = por %p164_p3, %p45_p0  ;;  %p171_p7 = scmp.lt.s32.totalorder %s2675_s21, 3 }
  0x11   : > { %s3147_s24 = scalar_select %p2749_p4, 1, 0 }
  0x12   : > { %s3148_s25 = scalar_select %p2754_p6, 1, 0 }
  0x13   : > { %p2759_p8 = pnand %p2084_p5, %p171_p7  ;;  %s2677_s27 = smov [#allocation7]  }
  0x14   : > { %s183_s28 = sshll.u32 %s2677_s27, 4  ;;  %s2678_s30 = smov [#allocation8]   ;;  %s184_s28 = int_to_ptr.vmem [resolvable:$true] %s183_s28 }
  0x15   : > { %p2363_p9 = pneg %p2759_p8  ;;  %s196_s6 = sshll.u32 %s2678_s30, 4  ;;  %s197_s6 = int_to_ptr.vmem [resolvable:$true] %s196_s6 }
  0x16   : > { %s2679_s7 = smov [#allocation10]   ;;  %s2476_s9 = scalar_lea.vmem %s184_s28, 512 }
  0x17   : > { %p2768_p11 = pnand %p2363_p9, %p3141_p1  ;;  %s209_s8 = sshll.u32 %s2679_s7, 4  ;;  %s210_s8 = int_to_ptr.vmem [resolvable:$true] %s209_s8 }
  0x18   : > { %p2477_p13 = scmp.ne.s32.totalorder %s184_s28, %s2476_s9  ;;  %p2484_p5 = scmp.lt.s32.totalorder %s184_s28, %s184_s28 }
  0x19   : > { %p2467_p12 = pneg %p2768_p11  ;;  %p2485_p7 = scmp.lt.s32.totalorder %s2476_s9, %s2476_s9 }
  0x1b   : > { %p2479_p0 = pnand %p2477_p13, %p2467_p12  ;;  %p2486_p9 = por %p2485_p7, %p2484_p5 }
  0x1d   : > { %p2480_p3 = pneg %p2479_p0 }
  0x1f   : > { %p2487_p10 = pnand %p2486_p9, %p2480_p3 }
  0x21   : > { %2490 = shalt.err (!%p2487_p10)
}
  0x22   : > { %s2680_s10 = smov 128   ;;  %s2681_s11 = smov 8  }
  0x23   : > { %s3151_s2 = sld [smem:[#allocation18_spill]]  ;;  %s2502_s14 = scalar_lea.vmem %s197_s6, 512 }
  0x24   : > { %p2503_p13 = scmp.ne.s32.totalorder %s197_s6, %s2502_s14  ;;  %p2510_p3 = scmp.lt.s32.totalorder %s197_s6, %s197_s6 }
  0x25   : > { %p2511_p10 = scmp.lt.s32.totalorder %s2502_s14, %s2502_s14 }
  0x26   : > { %p2505_p0 = pnand %p2503_p13, %p2467_p12 }
  0x27   : > { %p2512_p7 = por %p2511_p10, %p2510_p3 }
  0x28   : > { %p2506_p5 = pneg %p2505_p0 }
  0x29   : > { %2366 = dma.hbm_to_vmem [thread:$0]  (!%p2768_p11), %s3151_s2, 512, %s184_s28, [#allocation6], %s2680_s10, %s2680_s10, %s2681_s11  }
  0x2a   : > { %p2513_p9 = pnand %p2512_p7, %p2506_p5 }
  0x2c   : > { %2516 = shalt.err (!%p2513_p9)
}
  0x2d   : > { %s3152_s3 = sld [smem:[#allocation19_spill]]  ;;  %s2528_s17 = scalar_lea.vmem %s210_s8, 512 }
  0x2e   : > { %p2529_p1 = scmp.ne.s32.totalorder %s210_s8, %s2528_s17  ;;  %p2536_p3 = scmp.lt.s32.totalorder %s210_s8, %s210_s8 }
  0x2f   : > { %p2537_p5 = scmp.lt.s32.totalorder %s2528_s17, %s2528_s17 }
  0x30   : > { %p2531_p13 = pnand %p2529_p1, %p2467_p12 }
  0x31   : > { %p2538_p10 = por %p2537_p5, %p2536_p3 }
  0x32   : > { %p2532_p0 = pneg %p2531_p13 }
  0x33   : > { %2369 = dma.hbm_to_vmem [thread:$0]  (!%p2768_p11), %s3152_s3, 512, %s197_s6, [#allocation9], %s2680_s10, %s2680_s10, %s2681_s11  }
  0x34   : > { %p2539_p7 = pnand %p2538_p10, %p2532_p0 }
  0x36   : > { %2542 = shalt.err (!%p2539_p7)
}
  0x37   : > { %2372 = dma.hbm_to_vmem [thread:$0]  (!%p2768_p11), %s3139_s4, 512, %s210_s8, [#allocation9], %s2680_s10, %s2680_s10, %s2681_s11  }
  0x38   : > { %s2808_s28 = sadd.s32 1, %s2675_s21   ;;  %s32_s30 = sadd.s32 1, %s2671_s20 }
  0x39   : > { %s29_s29 = ssub.s32 %s2675_s21, %s2808_s28  ;;  %p39_p12 = scmp.ne.s32.totalorder %s2671_s20, %s2667_s19 }
  0x3a   : > { %p30_p1 = scmp.eq.s32.totalorder %s29_s29, 0  ;;  %p40_p9 = scmp.eq.s32.totalorder %s2675_s21, 0 }
  0x3b   : > { %p2387_p13 = scmp.lt.s32.totalorder %s2675_s21, 2  ;;  %p2822_p3 = por %p158_p2, %p39_p12 }
  0x3c   : > { %s2818_s6 = scalar_select %p30_p1, %s2671_s20, %s32_s30  }
  0x3d   : > { %p41_p0 = por %p40_p9, %p39_p12  ;;  %s2827_s9 = sand.u32 1, %s2671_s20  }
  0x3e   : > { %s3153_s7 = scalar_select %p2822_p3, 1, 0 }
  0x3f   : > { %s2149_s8 = sshll.u32 %s2675_s21, 8  ;;  %s2089_s12 = sshll.u32 %s2827_s9, 4 }
  0x40   : > { %s3154_s0 = sld [smem:[#allocation17_spill]]  ;;  %s227_s16 = scalar_lea.vmem [#allocation2], %s2089_s12 }
  0x41   : > { %s234_s17 = sshll.u32 %s227_s16, 4  ;;  %p2836_p2 = pnand %p2387_p13, %p41_p0  ;;  %s2840_s17 = int_to_ptr.vmem [resolvable:$true] %s234_s17 }
  0x43   : > { %p2545_p5 = pneg %p2836_p2 }
  0x46   : > { %s2834_s15 = scalar_lea.hbm %s3154_s0, %s2149_s8  ;;  %s2548_s13 = scalar_lea.hbm %s3154_s0, 512 }
  0x47   : > { %s2543_s30 = scalar_lea.hbm %s2834_s15, 256  ;;  %p2549_p1 = scmp.lt.s32.totalorder %s2834_s15, %s3154_s0 }
  0x48   : > { %p2544_p11 = scmp.ne.s32.totalorder %s2834_s15, %s2543_s30  ;;  %p2550_p12 = scmp.lt.s32.totalorder %s2548_s13, %s2543_s30 }
  0x4a   : > { %p2546_p10 = pnand %p2545_p5, %p2544_p11  ;;  %p2551_p9 = por %p2550_p12, %p2549_p1 }
  0x4c   : > { %p2547_p7 = pneg %p2546_p10 }
  0x4e   : > { %p2552_p13 = pnand %p2551_p9, %p2547_p7 }
  0x50   : > { %2555 = shalt.err (!%p2552_p13)
}
  0x51   : > { %s2556_s27 = scalar_lea.vmem %s2840_s17, 256  ;;  %s2682_s8 = smov [#allocation2]  }
  0x52   : > { %p2557_p0 = scmp.ne.s32.totalorder %s2840_s17, %s2556_s27  ;;  %s2561_s12 = sshll.u32 %s2682_s8, 4  ;;  %s2562_s12 = int_to_ptr.vmem [resolvable:$false] %s2561_s12 }
  0x53   : > { %s2563_s29 = scalar_lea.vmem %s2562_s12, 512  ;;  %p2564_p6 = scmp.lt.s32.totalorder %s2840_s17, %s2562_s12 }
  0x54   : > { %p2559_p11 = pnand %p2557_p0, %p2545_p5  ;;  %p2565_p3 = scmp.lt.s32.totalorder %s2563_s29, %s2556_s27 }
  0x56   : > { %p2560_p10 = pneg %p2559_p11  ;;  %p2566_p4 = por %p2565_p3, %p2564_p6 }
  0x58   : > { %p2567_p1 = pnand %p2566_p4, %p2560_p10 }
  0x5a   : > { %2570 = shalt.err (!%p2567_p1)
}
  0x5b   : > { %s3156_s30 = scalar_lea.sflag [#allocation3], %s2827_s9  ;;  %s2092_s13 = sshll.u32 %s2827_s9, 6 }
  0x5c   : > { %2376 = dma.hbm_to_vmem [thread:$0]  (!%p2836_p2), %s2834_s15, 256, %s2840_s17, %s3156_s30, %s2680_s10, %s2680_s10, %s2681_s11  }
  0x5d   : > { %s2150_s14 = sshll.u32 %s2675_s21, 10  ;;  %s248_s8 = scalar_lea.vmem [#allocation5], %s2092_s13 }
  0x5e   : > { %s2878_s16 = scalar_lea.hbm %s3136_s1, %s2150_s14  ;;  %s255_s12 = sshll.u32 %s248_s8, 4  ;;  %s2880_s12 = int_to_ptr.vmem [resolvable:$true] %s255_s12 }
  0x5f   : > { %s3157_s0 = sand.u32 1, %s2675_s21   ;;  %s2571_s3 = scalar_lea.hbm %s2878_s16, 1024 }
  0x60   : > { %s245_s2 = scalar_lea.sflag [#allocation6], %s3157_s0  ;;  %p2572_p4 = scmp.ne.s32.totalorder %s2878_s16, %s2571_s3 }
  0x61   : > { %s2576_s17 = scalar_lea.hbm %s3136_s1, 2048  ;;  %p2577_p7 = scmp.lt.s32.totalorder %s2878_s16, %s3136_s1 }
  0x62   : > { %p2574_p6 = pnand %p2572_p4, %p2545_p5  ;;  %p2578_p12 = scmp.lt.s32.totalorder %s2576_s17, %s2571_s3 }
  0x64   : > { %p2575_p3 = pneg %p2574_p6  ;;  %p2579_p9 = por %p2578_p12, %p2577_p7 }
  0x66   : > { %p2580_p13 = pnand %p2579_p9, %p2575_p3 }
  0x68   : > { %2583 = shalt.err (!%p2580_p13)
}
  0x69   : > { %s2584_s0 = scalar_lea.vmem %s2880_s12, 1024  ;;  %s2683_s13 = smov [#allocation5]  }
  0x6a   : > { %p2585_p0 = scmp.ne.s32.totalorder %s2880_s12, %s2584_s0  ;;  %s2589_s27 = sshll.u32 %s2683_s13, 4  ;;  %s2590_s27 = int_to_ptr.vmem [resolvable:$false] %s2589_s27 }
  0x6b   : > { %s2591_s29 = scalar_lea.vmem %s2590_s27, 2048  ;;  %p2592_p1 = scmp.lt.s32.totalorder %s2880_s12, %s2590_s27 }
  0x6c   : > { %p2587_p11 = pnand %p2585_p0, %p2545_p5  ;;  %p2593_p4 = scmp.lt.s32.totalorder %s2591_s29, %s2584_s0 }
  0x6e   : > { %p2588_p10 = pneg %p2587_p11  ;;  %p2594_p6 = por %p2593_p4, %p2592_p1 }
  0x70   : > { %p2595_p7 = pnand %p2594_p6, %p2588_p10 }
  0x72   : > { %2598 = shalt.err (!%p2595_p7)
}
  0x73   : > { %2379 = dma.hbm_to_vmem [thread:$0]  (!%p2836_p2), %s2878_s16, 1024, %s2880_s12, %s245_s2, %s2680_s10, %s2680_s10, %s2681_s11  }
  0x74   : > { %267 = sbr.rel (%p2759_p8) target bundleno = 1072 (0x430), region = 40  ;;  %s2912_s3 = sand.u32 (!%p2759_p8), 1, %s2667_s19  }
  0x75   : > { %s2096_s8 = sshll.u32 (!%p2759_p8), %s2912_s3, 4  ;;  %s270_s9 = scalar_lea.sflag (!%p2759_p8), [#allocation3], %s2912_s3 }
  0x76   : > { %s2918_s23 = scalar_lea.vmem (!%p2759_p8), [#allocation2], %s2096_s8  ;;  %p3158_p5 = scmp.ne.s32.totalorder (!%p2759_p8), %s3147_s24, 0 }
  0x79   : > { %2642 = dma.done.wait (%p3158_p5), %s270_s9, 256  }
  0x7a   : > { %2644 = vsyncadd (%p3158_p5), %s270_s9, 4294967040  ;;  %s278_s2 = sand.u32 1, %s2740_s22   ;;  %s2097_s26 = sshll.u32 %s2912_s3, 6 }
  0x7b   : > { %s279_s10 = scalar_lea.sflag [#allocation6], %s278_s2  ;;  %s2926_s11 = scalar_lea.vmem [#allocation5], %s2097_s26 }
  0x7c   : > { %2646 = dma.done.wait (%p3158_p5), %s279_s10, 1024  }
  0x7d   : > { %2648 = vsyncadd (%p3158_p5), %s279_s10, 4294966272  ;;  %p3159_p8 = scmp.eq.s32.totalorder %s2740_s22, 0 }
  0x7f   : > { %2650 = dma.done.wait (%p3159_p8), [#allocation6], 512   ;;  %p3160_p2 = pmov %p3159_p8 }
  0x81   : > { %2652 = vsyncadd (%p3160_p2), [#allocation6], 4294966784  ;;  %p3161_p3 = pmov %p3160_p2 }
  0x82   : > { %p3162_p12 = pmov %p3160_p2 }
  0x83   : > { %2654 = dma.done.wait (%p3161_p3), [#allocation9], 1024  }
  0x84   : > { %2656 = vsyncadd (%p3162_p12), [#allocation9], 4294966272  ;;  %v427_v0 = vld [vmem:[#allocation8 + $0x18] sm:$0xff]  ;;  %v426_v2 = vld [vmem:[#allocation8 + $0x10] sm:$0xff]  ;;  %vm332_vm0 = vcmask 261120   ;;  %v2684_v22 = vmov 0.0  }
  0x85   : > { %v331_v1 = vld [vmem:[#allocation7 + $0x18] sm:$0xff]  ;;  %2225 = vmatprep.subr.mxu1 %v427_v0  ;;  %v330_v3 = vld [vmem:[#allocation7 + $0x10] sm:$0xff]  ;;  %v425_v4 = vld [vmem:[#allocation8 + $0x8] sm:$0xff]  ;;  %vm2685_vm1 = vmmov 0   ;;  %vm1256_vm2 = vcmask 64512   ;;  %s2151_s24 = sshll.u32 %s2740_s22, 8 }
  0x86   : > { %2214 = vmatprep.subr.mxu0 %v331_v1  ;;  %2226 = vmatpush3.msra.mxu1 %v427_v0  ;;  %v329_v5 = vld [vmem:[#allocation7 + $0x8] sm:$0xff]  ;;  %v424_v6 = vld [vmem:[#allocation8] sm:$0xff]  ;;  %v418_v12 = vld [vmem:[%s2926_s11 + $0x10] sm:$0xff]  ;;  %s325_s16 = scalar_lea.vmem [#allocation11], %s2096_s8  ;;  %s3089_s30 = scalar_lea.hbm %s3140_s5, %s2151_s24 }
  0x87   : > { %2215 = vmatpush3.msra.mxu0 %v331_v1  ;;  %2227 = vmatprep.subr.mxu1 %v426_v2  ;;  %v328_v7 = vld [vmem:[#allocation7] sm:$0xff]  ;;  %v417_v10 = vld [vmem:[%s2926_s11 + $0x8] sm:$0xff]  ;;  %v560_v13 = vld [vmem:[#allocation10 + $0x18] sm:$0xff]  ;;  %s1959_s12 = sshll.u32 %s325_s16, 4  ;;  %s1946_s22 = scalar_lea.sflag [#allocation4], %s2912_s3  ;;  %s3091_s12 = int_to_ptr.vmem [resolvable:$true] %s1959_s12 }
  0x88   : > { %2216 = vmatprep.subr.mxu0 %v330_v3  ;;  %2228 = vmatpush3.msra.mxu1 %v426_v2  ;;  %v416_v8 = vld [vmem:[%s2926_s11] sm:$0xff]  ;;  %v327_v11 = vld [vmem:[%s2918_s23 + $0x8] sm:$0xff]  ;;  %v559_v14 = vld [vmem:[#allocation10 + $0x10] sm:$0xff]  ;;  %s2599_s14 = scalar_lea.vmem %s3091_s12, 256  ;;  %p3163_p13 = scmp.ne.s32.totalorder %s3153_s7, 0 }
  0x89   : > { %2217 = vmatpush3.msra.mxu0 %v330_v3  ;;  %2229 = vmatprep.subr.mxu1 %v425_v4  ;;  %v326_v9 = vld [vmem:[%s2918_s23] sm:$0xff]  ;;  %v419_v15 = vld [vmem:[%s2926_s11 + $0x18] sm:$0xff]  ;;  %v558_v17 = vld [vmem:[#allocation10 + $0x8] sm:$0xff]  ;;  %p2600_p9 = scmp.ne.s32.totalorder %s3091_s12, %s2599_s14  ;;  %s2686_s0 = smov [#allocation11]  }
  0x8a   : > { %2218 = vmatprep.subr.mxu0 %v329_v5  ;;  %2230 = vmatpush3.msra.mxu1 %v425_v4  ;;  %v420_v16 = vld [vmem:[%s2926_s11 + $0x20] sm:$0xff]  ;;  %v421_v19 = vld [vmem:[%s2926_s11 + $0x28] sm:$0xff]  ;;  %v422_v20 = vld [vmem:[%s2926_s11 + $0x30] sm:$0xff]  ;;  %s2603_s13 = sshll.u32 %s2686_s0, 4  ;;  %s2604_s13 = int_to_ptr.vmem [resolvable:$false] %s2603_s13 }
  0x8b   : > { %2219 = vmatpush3.msra.mxu0 %v329_v5  ;;  %2231 = vmatprep.subr.mxu1 %v424_v6  ;;  %v557_v18 = vld [vmem:[#allocation10] sm:$0xff]  ;;  %v423_v21 = vld [vmem:[%s2926_s11 + $0x38] sm:$0xff]  ;;  %p2601_p0 = pnand %p2600_p9, %p3163_p13  ;;  %s2605_s27 = scalar_lea.vmem %s2604_s13, 512 }
  0x8c   : > { %2220 = vmatprep.subr.mxu0 %v328_v7  ;;  %2232 = vmatpush3.msra.mxu1 %v424_v6  ;;  %p2606_p10 = scmp.lt.s32.totalorder %s3091_s12, %s2604_s13  ;;  %p2607_p1 = scmp.lt.s32.totalorder %s2605_s27, %s2599_s14 }
  0x8d   : > { %2233 = vmatprep.mubr.msk.f32.mxu1 %vm332_vm0, %v416_v8  ;;  %2221 = vmatpush3.msra.mxu0 %v328_v7  ;;  %p2602_p11 = pneg %p2601_p0 }
  0x8e   : > { %2222 = vmatprep.mubr.msk.f32.mxu0 %vm332_vm0, %v326_v9  ;;  %2234 = vmatmul.mubr.msk.f32.vlgmr.msra.gmra.mxu1 %vm332_vm0, %v417_v10  ;;  %p2608_p4 = por %p2607_p1, %p2606_p10 }
  0x8f   : > { %2223 = vmatmul.mubr.msk.f32.vlgmr.msra.gmra.mxu0 %vm332_vm0, %v327_v11  ;;  %2236 = vmatprep.mubr.msk.f32.mxu1 %vm332_vm0, %v418_v12 }
  0x90   : > { %2245 = vmatprep.subr.mxu0 %v560_v13  ;;  %2253 = vmatprep.mubr.msk.f32.mxu0 %vm332_vm0, %v416_v8  ;;  %p2609_p6 = pnand %p2608_p4, %p2602_p11 }
  0x91   : > { %2246 = vmatpush3.msra.mxu0 %v560_v13  ;;  %2265 = vmatprep.subr.mxu1 %v2684_v22 }
  0x92   : > { %2247 = vmatprep.subr.mxu0 %v559_v14  ;;  %2237 = vmatmul.mubr.msk.f32.gmra.mxu1 %vm332_vm0, %v419_v15 }
  0x93   : > { %2248 = vmatpush3.msra.mxu0 %v559_v14  ;;  %2239 = vmatprep.mubr.msk.f32.mxu1 %vm332_vm0, %v420_v16 }
  0x94   : > { %2249 = vmatprep.subr.mxu0 %v558_v17 }
  0x95   : > { %2250 = vmatpush3.msra.mxu0 %v558_v17 }
  0x96   : > { %2251 = vmatprep.subr.mxu0 %v557_v18  ;;  %2240 = vmatmul.mubr.msk.f32.gmra.mxu1 %vm332_vm0, %v421_v19 }
  0x97   : > { %2252 = vmatpush3.msra.mxu0 %v557_v18  ;;  %2242 = vmatprep.mubr.msk.f32.mxu1 %vm332_vm0, %v422_v20 }
  0x98   : > { %2254 = vmatmul.mubr.msk.f32.vlgmr.msra.gmra.mxu0 %vm332_vm0, %v417_v10  ;;  %2275 = vmatprep.subr.mxu0 %v2684_v22 }
  0x99   : > { %2256 = vmatprep.mubr.msk.f32.mxu0 %vm332_vm0, %v418_v12 }
  0x9a   : > { %2243 = vmatmul.mubr.msk.f32.gmra.mxu1 %vm332_vm0, %v423_v21 }
  0x9b   : > { %2267 = vmatprep.mubr.msk.f32.mxu1 %vm2685_vm1, %v2684_v22 }
  0x9c   : > { %2257 = vmatmul.mubr.msk.f32.gmra.mxu0 %vm332_vm0, %v419_v15 }
  0x9d   : > { %2259 = vmatprep.mubr.msk.f32.mxu0 %vm332_vm0, %v420_v16 }
  0xa0   : > { %2260 = vmatmul.mubr.msk.f32.gmra.mxu0 %vm332_vm0, %v421_v19 }
  0xa1   : > { %2262 = vmatprep.mubr.msk.f32.mxu0 %vm332_vm0, %v422_v20 }
  0xa4   : > { %2263 = vmatmul.mubr.msk.f32.gmra.mxu0 %vm332_vm0, %v423_v21 }
  0xa5   : > { %2277 = vmatprep.mubr.msk.f32.mxu0 %vm2685_vm1, %v2684_v22 }
 0x14e   : > { %v2235_v23 = vpop.f32.mrf.mxu1 }
 0x14f   : > { %v2224_v24 = vpop.f32.mrf.mxu0 }
 0x150   : > { %v518_v25 = vpop.f32.mrf.mxu1  ;;  %v415_v30 = vmul.f32 0.17677669, %v2224_v24 }
 0x151   : > { %v405_v26 = vpop.f32.mrf.mxu0  ;;  %2266 = vmatpush3.xpose.msk.msra.mxu1 %vm332_vm0, %v518_v25 }
 0x152   : > { %v414_v27 = vmul.f32 0.17677669, %v405_v26  ;;  %v2238_v28 = vpop.f32.mrf.mxu1  ;;  %2270 = vmatprep.subr.mxu1 %v2684_v22 }
 0x154   : > { %v528_v29 = vpop.f32.mrf.mxu1  ;;  %2268 = vmatmul.mubr.msk.f32.vlgmr.msra.gmra.mxu1 %vm332_vm0, %v414_v27 }
 0x155   : > { %2271 = vmatpush3.xpose.msk.msra.mxu1 %vm332_vm0, %v2235_v23  ;;  %2276 = vmatpush3.xpose.msk.msra.mxu0 %vm332_vm0, %v528_v29 }
 0x156   : > { %v2241_v31 = vpop.f32.mrf.mxu1  ;;  %2272 = vmatprep.mubr.msk.f32.mxu1 %vm2685_vm1, %v2684_v22  ;;  %2280 = vmatprep.subr.mxu1 %v2684_v22 }
 0x157   : > { %2285 = vmatprep.subr.mxu0 %v2684_v22 }
 0x158   : > { %v538_v32 = vpop.f32.mrf.mxu1  ;;  %2273 = vmatmul.mubr.msk.f32.vlgmr.msra.gmra.mxu1 %vm332_vm0, %v415_v30  ;;  %2278 = vmatmul.mubr.msk.f32.vlgmr.msra.gmra.mxu0 %vm332_vm0, %v414_v27  ;;  %v2255_v34 = vpop.f32.mrf.mxu0 }
 0x159   : > { %2281 = vmatpush3.xpose.msk.msra.mxu1 %vm332_vm0, %v2238_v28  ;;  %2286 = vmatpush3.xpose.msk.msra.mxu0 %vm332_vm0, %v538_v32 }
 0x15a   : > { %v2244_v33 = vpop.f32.mrf.mxu1  ;;  %2282 = vmatprep.mubr.msk.f32.mxu1 %vm2685_vm1, %v2684_v22  ;;  %2287 = vmatprep.mubr.msk.f32.mxu0 %vm2685_vm1, %v2684_v22  ;;  %v627_v36 = vpop.f32.mrf.mxu0 }
 0x15b   : > { %2290 = vmatprep.subr.mxu1 %v2684_v22  ;;  %2295 = vmatprep.subr.mxu0 %v2684_v22 }
 0x15c   : > { %v548_v35 = vpop.f32.mrf.mxu1  ;;  %2283 = vmatmul.mubr.msk.f32.vlgmr.msra.gmra.mxu1 %vm332_vm0, %v415_v30  ;;  %2288 = vmatmul.mubr.msk.f32.vlgmr.msra.gmra.mxu0 %vm332_vm0, %v414_v27  ;;  %v3016_v37 = vpop.f32.mrf.mxu0 }
 0x15d   : > { %2291 = vmatpush3.xpose.msk.msra.mxu1 %vm332_vm0, %v2241_v31  ;;  %2296 = vmatpush3.xpose.msk.msra.mxu0 %vm332_vm0, %v548_v35 }
 0x15e   : > { %2292 = vmatprep.mubr.msk.f32.mxu1 %vm2685_vm1, %v2684_v22  ;;  %2297 = vmatprep.mubr.msk.f32.mxu0 %vm2685_vm1, %v2684_v22  ;;  %v3018_v38 = vpop.f32.mrf.mxu0 }
 0x15f   : > { %2300 = vmatprep.subr.mxu1 %v2684_v22  ;;  %2305 = vmatprep.subr.mxu0 %v2684_v22 }
 0x160   : > { %2293 = vmatmul.mubr.msk.f32.vlgmr.msra.gmra.mxu1 %vm332_vm0, %v415_v30  ;;  %2298 = vmatmul.mubr.msk.f32.vlgmr.msra.gmra.mxu0 %vm332_vm0, %v414_v27  ;;  %v3020_v39 = vpop.f32.mrf.mxu0 }
 0x161   : > { %2301 = vmatpush3.xpose.msk.msra.mxu1 %vm332_vm0, %v2244_v33  ;;  %2302 = vmatprep.mubr.msk.f32.mxu1 %vm2685_vm1, %v2684_v22 }
 0x162   : > { %2310 = vmatprep.subr.mxu1 %v2684_v22  ;;  %2306 = vmatpush3.msra.mxu0 %v627_v36  ;;  %v3022_v40 = vpop.f32.mrf.mxu0 }
 0x163   : > { %2307 = vmatprep.mubr.msk.f32.mxu0 %vm2685_vm1, %v2684_v22  ;;  %2315 = vmatprep.subr.mxu0 %v2684_v22 }
 0x164   : > { %2303 = vmatmul.mubr.msk.f32.vlgmr.msra.gmra.mxu1 %vm332_vm0, %v415_v30  ;;  %v3024_v41 = vpop.f32.mrf.mxu0 }
 0x165   : > { %2311 = vmatpush3.msra.mxu1 %v2255_v34  ;;  %2312 = vmatprep.mubr.msk.f32.mxu1 %vm2685_vm1, %v2684_v22 }
 0x166   : > { %2320 = vmatprep.subr.mxu1 %v2684_v22  ;;  %v3027_v44 = vpop.f32.mrf.mxu0 }
 0x214   : > { %v738_v42 = vpop.f32.mrf.mxu1 }
 0x215   : > { %v1257_v43 = vsel %vm1256_vm2, %v738_v42, -inf }
 0x216   : > { %1258 = vmax.xlane.f32.xlu0 %v1257_v43  ;;  %v2269_v45 = vpop.f32.mrf.mxu1 }
 0x218   : > { %v814_v46 = vpop.f32.mrf.mxu1  ;;  %v887_v47 = vpop.f32.mrf.mxu0 }
 0x219   : > { %v1263_v48 = vsel %vm1256_vm2, %v887_v47, -inf  ;;  %v1260_v49 = vsel %vm1256_vm2, %v814_v46, -inf }
 0x21a   : > { %1264 = vmax.xlane.f32.xlu1 %v1263_v48  ;;  %v2279_v50 = vpop.f32.mrf.mxu0  ;;  %1261 = vmax.xlane.f32.xlu0 %v1260_v49  ;;  %v2274_v51 = vpop.f32.mrf.mxu1 }
 0x21c   : > { %v960_v52 = vpop.f32.mrf.mxu1  ;;  %v1033_v53 = vpop.f32.mrf.mxu0 }
 0x21d   : > { %v1269_v54 = vsel %vm1256_vm2, %v1033_v53, -inf  ;;  %v1266_v55 = vsel %vm1256_vm2, %v960_v52, -inf }
 0x21e   : > { %v2289_v56 = vpop.f32.mrf.mxu0  ;;  %1270 = vmax.xlane.f32.xlu0 %v1269_v54  ;;  %1267 = vmax.xlane.f32.xlu1 %v1266_v55  ;;  %v2284_v57 = vpop.f32.mrf.mxu1 }
 0x220   : > { %v1106_v58 = vpop.f32.mrf.mxu1  ;;  %v1179_v59 = vpop.f32.mrf.mxu0 }
 0x221   : > { %v1275_v60 = vsel %vm1256_vm2, %v1179_v59, -inf  ;;  %v1272_v61 = vsel %vm1256_vm2, %v1106_v58, -inf }
 0x222   : > { %v2299_v62 = vpop.f32.mrf.mxu0  ;;  %1276 = vmax.xlane.f32.xlu0 %v1275_v60  ;;  %1273 = vmax.xlane.f32.xlu1 %v1272_v61  ;;  %v2294_v63 = vpop.f32.mrf.mxu1 }
 0x224   : > { %v1252_v0 = vpop.f32.mrf.mxu1 }
 0x225   : > { %v1278_v1 = vsel %vm1256_vm2, %v1252_v0, -inf }
 0x226   : > { %1279 = vmax.xlane.f32.xlu1 %v1278_v1  ;;  %v2304_v2 = vpop.f32.mrf.mxu1 }
 0x29f   : > { %v1259_v3 = vpop.xlane.xlu0 %1258 }
 0x2a0   : > { %v1281_v4 = vsub.f32 %v738_v42, %v1259_v3 }
 0x2a2   : > { %v1289_v5 = vmul.f32 1.442695, %v1281_v4 }
 0x2a3   : > { %v1265_v6 = vpop.xlane.xlu1 %1264  ;;  %v1262_v7 = vpop.xlane.xlu0 %1261 }
 0x2a4   : > { %2433 = vpow2.f32 %v1289_v5  ;;  %v1283_v8 = vsub.f32 %v887_v47, %v1265_v6  ;;  %v1282_v9 = vsub.f32 %v814_v46, %v1262_v7 }
 0x2a6   : > { %v1293_v10 = vmul.f32 1.442695, %v1283_v8  ;;  %v1291_v11 = vmul.f32 1.442695, %v1282_v9 }
 0x2a7   : > { %v1271_v12 = vpop.xlane.xlu0 %1270  ;;  %v1268_v13 = vpop.xlane.xlu1 %1267 }
 0x2a8   : > { %2435 = vpow2.f32 %v1293_v10  ;;  %v1285_v14 = vsub.f32 %v1033_v53, %v1271_v12  ;;  %v1284_v15 = vsub.f32 %v960_v52, %v1268_v13 }
 0x2a9   : > { %2437 = vpow2.f32 %v1291_v11 }
 0x2aa   : > { %v1297_v16 = vmul.f32 1.442695, %v1285_v14  ;;  %v1295_v17 = vmul.f32 1.442695, %v1284_v15 }
 0x2ab   : > { %v1277_v18 = vpop.xlane.xlu0 %1276  ;;  %v1274_v19 = vpop.xlane.xlu1 %1273 }
 0x2ac   : > { %2439 = vpow2.f32 %v1297_v16  ;;  %v1287_v20 = vsub.f32 %v1179_v59, %v1277_v18  ;;  %v1286_v21 = vsub.f32 %v1106_v58, %v1274_v19 }
 0x2ad   : > { %2441 = vpow2.f32 %v1295_v17 }
 0x2ae   : > { %v1301_v23 = vmul.f32 1.442695, %v1287_v20  ;;  %v1299_v24 = vmul.f32 1.442695, %v1286_v21 }
 0x2af   : > { %v1280_v25 = vpop.xlane.xlu1 %1279 }
 0x2b0   : > { %2443 = vpow2.f32 %v1301_v23  ;;  %v1288_v26 = vsub.f32 %v1252_v0, %v1280_v25 }
 0x2b1   : > { %v2434_v27 = vpop.eup %2433  ;;  %2445 = vpow2.f32 %v1299_v24 }
 0x2b2   : > { %v1303_v28 = vmul.f32 1.442695, %v1288_v26  ;;  %v1305_v29 = vsel %vm1256_vm2, %v2434_v27, 0.0 }
 0x2b3   : > { %1306 = vadd.xlane.f32.xlu0 %v1305_v29 }
 0x2b4   : > { %2447 = vpow2.f32 %v1303_v28 }
 0x2b5   : > { %v2436_v30 = vpop.eup %2435 }
 0x2b6   : > { %v2438_v31 = vpop.eup %2437  ;;  %v1311_v32 = vsel %vm1256_vm2, %v2436_v30, 0.0 }
 0x2b7   : > { %1312 = vadd.xlane.f32.xlu0 %v1311_v32  ;;  %v1308_v33 = vsel %vm1256_vm2, %v2438_v31, 0.0 }
 0x2b8   : > { %1309 = vadd.xlane.f32.xlu1 %v1308_v33 }
 0x2b9   : > { %v2440_v34 = vpop.eup %2439 }
 0x2ba   : > { %v2442_v35 = vpop.eup %2441  ;;  %v1317_v36 = vsel %vm1256_vm2, %v2440_v34, 0.0 }
 0x2bb   : > { %1318 = vadd.xlane.f32.xlu0 %v1317_v36  ;;  %v1314_v42 = vsel %vm1256_vm2, %v2442_v35, 0.0 }
 0x2bc   : > { %1315 = vadd.xlane.f32.xlu1 %v1314_v42 }
 0x2bd   : > { %v2444_v43 = vpop.eup %2443 }
 0x2be   : > { %v2446_v45 = vpop.eup %2445  ;;  %v1323_v46 = vsel %vm1256_vm2, %v2444_v43, 0.0 }
 0x2bf   : > { %1324 = vadd.xlane.f32.xlu0 %v1323_v46  ;;  %v1320_v47 = vsel %vm1256_vm2, %v2446_v45, 0.0 }
 0x2c0   : > { %1321 = vadd.xlane.f32.xlu1 %v1320_v47 }
 0x2c1   : > { %v2448_v48 = vpop.eup %2447 }
 0x2c2   : > { %v1326_v49 = vsel %vm1256_vm2, %v2448_v48, 0.0 }
 0x2c4   : > { %1327 = vadd.xlane.f32.xlu1 %v1326_v49 }
 0x33c   : > { %v1307_v50 = vpop.xlane.xlu0 %1306 }
 0x33d   : > { %2449 = vrcp.f32 %v1307_v50 }
 0x340   : > { %v1313_v51 = vpop.xlane.xlu0 %1312 }
 0x341   : > { %2451 = vrcp.f32 %v1313_v51  ;;  %v1310_v52 = vpop.xlane.xlu1 %1309 }
 0x342   : > { %2453 = vrcp.f32 %v1310_v52 }
 0x344   : > { %v1319_v53 = vpop.xlane.xlu0 %1318 }
 0x345   : > { %2455 = vrcp.f32 %v1319_v53  ;;  %v1316_v54 = vpop.xlane.xlu1 %1315 }
 0x346   : > { %2457 = vrcp.f32 %v1316_v54 }
 0x348   : > { %v1325_v55 = vpop.xlane.xlu0 %1324 }
 0x349   : > { %2459 = vrcp.f32 %v1325_v55  ;;  %v1322_v56 = vpop.xlane.xlu1 %1321 }
 0x34a   : > { %v2450_v57 = vpop.eup %2449  ;;  %2461 = vrcp.f32 %v1322_v56 }
 0x34b   : > { %v1337_v58 = vmul.f32 %v2450_v57, %v2434_v27 }
 0x34d   : > { %v1328_v59 = vpop.xlane.xlu1 %1327  ;;  %2308 = vmatmul.mubr.msk.f32.vlgmr.msra.gmra.mxu0 %vm1256_vm2, %v1337_v58 }
 0x34e   : > { %v2452_v60 = vpop.eup %2451  ;;  %2463 = vrcp.f32 %v1328_v59  ;;  %2316 = vmatpush3.msra.mxu0 %v3018_v38  ;;  %2317 = vmatprep.mubr.msk.f32.mxu0 %vm2685_vm1, %v2684_v22 }
 0x34f   : > { %v2454_v61 = vpop.eup %2453  ;;  %2325 = vmatprep.subr.mxu0 %v2684_v22  ;;  %v1339_v62 = vmul.f32 %v2452_v60, %v2436_v30 }
 0x350   : > { %v1338_v63 = vmul.f32 %v2454_v61, %v2438_v31 }
 0x351   : > { %2318 = vmatmul.mubr.msk.f32.vlgmr.msra.gmra.mxu0 %vm1256_vm2, %v1339_v62 }
 0x352   : > { %v2456_v0 = vpop.eup %2455  ;;  %2313 = vmatmul.mubr.msk.f32.vlgmr.msra.gmra.mxu1 %vm1256_vm2, %v1338_v63  ;;  %2326 = vmatpush3.msra.mxu0 %v3022_v40 }
 0x353   : > { %v2458_v1 = vpop.eup %2457  ;;  %2321 = vmatpush3.msra.mxu1 %v3016_v37  ;;  %2322 = vmatprep.mubr.msk.f32.mxu1 %vm2685_vm1, %v2684_v22  ;;  %v1341_v38 = vmul.f32 %v2456_v0, %v2440_v34 }
 0x354   : > { %2327 = vmatprep.mubr.msk.f32.mxu0 %vm2685_vm1, %v2684_v22  ;;  %2330 = vmatprep.subr.mxu1 %v2684_v22  ;;  %v1340_v2 = vmul.f32 %v2458_v1, %v2442_v35 }
 0x355   : > { %2335 = vmatprep.subr.mxu0 %v2684_v22  ;;  %2328 = vmatmul.mubr.msk.f32.vlgmr.msra.gmra.mxu0 %vm1256_vm2, %v1341_v38 }
 0x356   : > { %v2460_v3 = vpop.eup %2459  ;;  %2323 = vmatmul.mubr.msk.f32.vlgmr.msra.gmra.mxu1 %vm1256_vm2, %v1340_v2  ;;  %2336 = vmatpush3.msra.mxu0 %v3027_v44 }
 0x357   : > { %v2462_v37 = vpop.eup %2461  ;;  %2331 = vmatpush3.msra.mxu1 %v3020_v39  ;;  %2332 = vmatprep.mubr.msk.f32.mxu1 %vm2685_vm1, %v2684_v22  ;;  %v1343_v40 = vmul.f32 %v2460_v3, %v2444_v43 }
 0x358   : > { %2337 = vmatprep.mubr.msk.f32.mxu0 %vm2685_vm1, %v2684_v22  ;;  %2340 = vmatprep.subr.mxu1 %v2684_v22  ;;  %v1342_v4 = vmul.f32 %v2462_v37, %v2446_v45 }
 0x359   : > { %2338 = vmatmul.mubr.msk.f32.vlgmr.msra.gmra.mxu0 %vm1256_vm2, %v1343_v40 }
 0x35a   : > { %2333 = vmatmul.mubr.msk.f32.vlgmr.msra.gmra.mxu1 %vm1256_vm2, %v1342_v4 }
 0x35b   : > { %v2464_v5 = vpop.eup %2463  ;;  %2341 = vmatpush3.msra.mxu1 %v3024_v41  ;;  %2342 = vmatprep.mubr.msk.f32.mxu1 %vm2685_vm1, %v2684_v22 }
 0x35c   : > { %v1344_v39 = vmul.f32 %v2464_v5, %v2448_v48 }
 0x35e   : > { %2343 = vmatmul.mubr.msk.f32.vlgmr.msra.gmra.mxu1 %vm1256_vm2, %v1344_v39 }
 0x40d   : > { %v1414_v44 = vpop.f32.mrf.mxu0 }
 0x40e   : > { %v1929_v13 = vsel %vm332_vm0, %v1414_v44, 0.0 }
 0x40f   : > { %v2309_v6 = vpop.f32.mrf.mxu0 }
 0x411   : > { %v1560_v7 = vpop.f32.mrf.mxu0 }
 0x412   : > { %v1487_v8 = vpop.f32.mrf.mxu1  ;;  %v1930_v10 = vsel %vm332_vm0, %v1560_v7, 0.0 }
 0x413   : > { %v2319_v9 = vpop.f32.mrf.mxu0  ;;  %v1931_v22 = vadd.f32 %v1930_v10, %v1929_v13  ;;  %v1936_v23 = vsel %vm332_vm0, %v1487_v8, 0.0 }
 0x414   : > { %v2314_v11 = vpop.f32.mrf.mxu1 }
 0x415   : > { %v1706_v12 = vpop.f32.mrf.mxu0 }
 0x416   : > { %v1633_v14 = vpop.f32.mrf.mxu1  ;;  %v1932_v41 = vsel %vm332_vm0, %v1706_v12, 0.0 }
 0x417   : > { %v2329_v15 = vpop.f32.mrf.mxu0  ;;  %v1937_v17 = vsel %vm332_vm0, %v1633_v14, 0.0  ;;  %v1933_v18 = vadd.f32 %v1932_v41, %v1931_v22 }
 0x418   : > { %v2324_v16 = vpop.f32.mrf.mxu1  ;;  %v1938_v27 = vadd.f32 %v1937_v17, %v1936_v23 }
 0x419   : > { %v1852_v19 = vpop.f32.mrf.mxu0 }
 0x41a   : > { %v1779_v20 = vpop.f32.mrf.mxu1  ;;  %v1934_v21 = vsel %vm332_vm0, %v1852_v19, 0.0 }
 0x41b   : > { %v1939_v24 = vsel %vm332_vm0, %v1779_v20, 0.0  ;;  %v1935_v25 = vadd.f32 %v1934_v21, %v1933_v18  ;;  %v2339_v26 = vpop.f32.mrf.mxu0 }
 0x41c   : > { %v2334_v28 = vpop.f32.mrf.mxu1  ;;  %v1940_v29 = vadd.f32 %v1939_v24, %v1938_v27 }
 0x41d   : > { %1943 = vst.msk [vmem:[%s325_s16] sm:$0xff] %vm332_vm0, %v1935_v25 }
 0x41e   : > { %v1925_v30 = vpop.f32.mrf.mxu1 }
 0x41f   : > { %v1941_v31 = vsel %vm332_vm0, %v1925_v30, 0.0 }
 0x420   : > { %v1942_v32 = vadd.f32 %v1941_v31, %v1940_v29  ;;  %v2344_v33 = vpop.f32.mrf.mxu1 }
 0x422   : > { %1944 = vst.msk [vmem:[%s325_s16 + $0x8] sm:$0xff] %vm332_vm0, %v1942_v32 }
 0x423   : > { %2612 = shalt.err (!%p2609_p6)
}
 0x424   : > { %s2613_s29 = scalar_lea.hbm %s3089_s30, 256  ;;  %s2617_s23 = scalar_lea.hbm %s3140_s5, 512 }
 0x425   : > { %p2614_p7 = scmp.ne.s32.totalorder %s3089_s30, %s2613_s29  ;;  %p2618_p2 = scmp.lt.s32.totalorder %s3089_s30, %s3140_s5 }
 0x426   : > { %p2619_p3 = scmp.lt.s32.totalorder %s2617_s23, %s2613_s29 }
 0x427   : > { %p2615_p5 = pnand %p2614_p7, %p3163_p13 }
 0x428   : > { %p2620_p12 = por %p2619_p3, %p2618_p2 }
 0x429   : > { %p2616_p8 = pneg %p2615_p5 }
 0x42b   : > { %p2621_p9 = pnand %p2620_p12, %p2616_p8 }
 0x42d   : > { %2624 = shalt.err (!%p2621_p9)
}
 0x42e   : > { %s2687_s10 = smov 128   ;;  %s2688_s11 = smov 8  }
 0x42f   : > { %2361 = dma.vmem_to_hbm [thread:$0]  (%p3163_p13), %s3091_s12, 256, %s3089_s30, %s1946_s22, %s2687_s10, %s2687_s10, %s2688_s11  }
 0x430 PF: > { %s1974_s24 = sand.u32 1, %s2663_s18   ;;  %p3164_p0 = scmp.ne.s32.totalorder %s3148_s25, 0 }
 0x431   : > { %p3165_p11 = scmp.ge.s32.totalorder %s2675_s21, 2  ;;  %s1975_s16 = scalar_lea.sflag [#allocation4], %s1974_s24 }
 0x433   : > { %p2381_p10 = pnand %p3165_p11, %p3164_p0 }
 0x435   : > { %p2382_p1 = pneg %p2381_p10 }
 0x437   : > { %2658 = dma.done.wait (%p2382_p1), %s1975_s16, 256  }
 0x438   : > { %2660 = vsyncadd (%p2382_p1), %s1975_s16, 4294967040  ;;  %p22_p4 = scmp.ge.s32.totalorder %s2808_s28, 4   ;;  %s3166_s18 = smov %s2667_s19 }
 0x439   : > { %s3167_s19 = smov %s2671_s20  ;;  %s3168_s20 = smov %s2818_s6 }
 0x43a   : > { %s3169_s21 = smov %s2808_s28  ;;  %24 = sbr.rel (!%p22_p4) target bundleno = 12 (0xc), region = 110 }
 0x43f   :  { %1980 = vsyncpa [#allocation3], 1 }
 0x440   :  { %1982 = vsyncpa [#allocation3 + $0x1], 1 }
 0x441   :  { %1983 = vsyncpa [#allocation6], 1 }
 0x442   :  { %1985 = vsyncpa [#allocation6 + $0x1], 1 }
 0x443   :  { %1986 = vsyncpa [#allocation9], 1 }
 0x444   :  { %1987 = vsyncpa [#allocation4], 1 }
 0x445   :  { %1989 = vsyncpa [#allocation4 + $0x1], 1 }

</bundles_post_ra>
